<compile_context>
chip_gen: v7x
topology: tpu7x:2x2x1
jax: 0.10.0
libtpu: 0.0.40
codegen_flags: <defaults>
</compile_context>

<pallas_src>
import functools

import jax
import jax.numpy as jnp
from jax.experimental import pallas as pl
from jax.experimental.pallas import tpu as pltpu

FEATURE_SIZE = 256


def _round_up(x, m):
    return ((x + m - 1) // m) * m


def _linear_relu_kernel(x_ref, w_ref, b_ref, o_ref):
    # One (tile_m, K) x (K, N) matmul per grid step; K and N kept whole.
    y = jnp.dot(x_ref[...], w_ref[...], preferred_element_type=jnp.float32)
    y = y + b_ref[...]  # b_ref is (1, N) f32, broadcasts over rows
    o_ref[...] = jnp.maximum(y, 0.0).astype(o_ref.dtype)


@functools.partial(jax.jit, static_argnames=("tm", "use_bf16"))
def nature_cnn_forward(states, w, b, *, tm=4096, use_bf16=False):
    """states: (B, obs_size); w: (obs_size, 256) (pre-transposed); b: (256,)."""
    B, K = states.shape
    N = w.shape[1]
    out_dtype = states.dtype

    # Batch tile: big enough to amortize per-step pipeline overhead (~0.35us),
    # small enough to (a) stay under every generation's default scoped VMEM and
    # (b) give >= 2 grid steps when B allows it (uses both TCs on v7x).
    tile_m = max(8, min(tm, _round_up(pl.cdiv(B, 2), 8)))
    grid_m = pl.cdiv(B, tile_m)  # last block may be ragged; Pallas masks writes

    if use_bf16:
        # ~2x less x/W traffic; accumulation stays f32 via preferred_element_type.
        states = states.astype(jnp.bfloat16)
        w = w.astype(jnp.bfloat16)
    b2d = b.reshape(1, N).astype(jnp.float32)

    out = pl.pallas_call(
        _linear_relu_kernel,
        out_shape=jax.ShapeDtypeStruct((B, N), out_dtype),
        grid_spec=pltpu.PrefetchScalarGridSpec(
            num_scalar_prefetch=0,
            grid=(grid_m,),
            in_specs=[
                pl.BlockSpec((tile_m, K), lambda i: (i, 0)),  # x tile marches over batch
                # Constant index_maps -> block index never changes, so Pallas
                # does not re-DMA W / bias across grid steps (stays resident).
                pl.BlockSpec((K, N), lambda i: (0, 0)),
                pl.BlockSpec((1, N), lambda i: (0, 0)),
            ],
            out_specs=pl.BlockSpec((tile_m, N), lambda i: (i, 0)),
        ),
        compiler_params=pltpu.CompilerParams(
            # Shards batch steps across TCs on v7x (grid_m >= 2 whenever B >= 16);
            # neutral on single-TC v5e/v6e.
            dimension_semantics=("parallel",),
        ),
        cost_estimate=pl.CostEstimate(
            flops=2 * B * K * N,
            bytes_accessed=4 * (B * K + K * N + N + B * N),
            transcendentals=0,
        ),
    )(states, w, b2d)

    return out


def init_params(key, obs_size, feature_size=FEATURE_SIZE):
    """Deterministic init mimicking nn.Linear default (uniform +/- 1/sqrt(fan_in))."""
    kw, kb = jax.random.split(key)
    bound = 1.0 / (obs_size ** 0.5)
    # Stored already transposed: (obs_size, feature_size) so the kernel does x @ W.
    w = jax.random.uniform(kw, (obs_size, feature_size), jnp.float32, -bound, bound)
    b = jax.random.uniform(kb, (feature_size,), jnp.float32, -bound, bound)
    return w, b


if __name__ == "__main__":
    key = jax.random.PRNGKey(0)
    k_x, k_x2, k_p = jax.random.split(key, 3)

    obs_size = 32  # small state vector
    w, b = init_params(k_p, obs_size)

    # Case 1: batch a multiple of 8 -> tile_m=8, single grid step, no masking.
    batch = 8
    states = jax.random.normal(k_x, (batch, obs_size), jnp.float32)
    out = jax.block_until_ready(nature_cnn_forward(states, w, b))
    ref = jnp.maximum(states @ w + b[None, :], 0.0)
    assert out.shape == (batch, FEATURE_SIZE)
    assert jnp.allclose(out, ref, atol=1e-5, rtol=1e-5)

    # Case 2: ragged batch (12 rows, tile_m=8 -> grid=2, masked last block).
    batch2 = 12
    states2 = jax.random.normal(k_x2, (batch2, obs_size), jnp.float32)
    out2 = jax.block_until_ready(nature_cnn_forward(states2, w, b))
    ref2 = jnp.maximum(states2 @ w + b[None, :], 0.0)
    assert out2.shape == (batch2, FEATURE_SIZE)
    assert jnp.allclose(out2, ref2, atol=1e-5, rtol=1e-5)

    # Case 3 (optional bandwidth lever): bf16 inputs/weights, f32 accumulation.
    out3 = jax.block_until_ready(nature_cnn_forward(states2, w, b, use_bf16=True))
    assert out3.shape == (batch2, FEATURE_SIZE)
    assert jnp.allclose(out3, ref2, atol=3e-2, rtol=3e-2)

    print("KERNEL_OK")
</pallas_src>

<mosaic_0001>
module attributes {stable_mosaic.version = 11 : i64} {
  func.func @_linear_relu_kernel(%arg0: i32, %arg1: memref<8x32xf32, #tpu.memory_space<vmem>>, %arg2: memref<32x256xf32, #tpu.memory_space<vmem>>, %arg3: memref<1x256xf32, #tpu.memory_space<vmem>>, %arg4: memref<8x256xf32, #tpu.memory_space<vmem>>) attributes {dimension_semantics = [#tpu.dimension_semantics<parallel>], iteration_bounds = array<i64: 1>, scalar_prefetch = 0 : i64, scratch_operands = 0 : i64, tpu.core_type = #tpu.core_type<tc>, window_params = [{transform_indices = @transform_0, window_bounds = array<i64: 8, 32>}, {pipeline_mode = #tpu.pipeline_mode<synchronous>, transform_indices = @transform_1, window_bounds = array<i64: 32, 256>}, {pipeline_mode = #tpu.pipeline_mode<synchronous>, transform_indices = @transform_2, window_bounds = array<i64: 1, 256>}, {transform_indices = @transform_3, window_bounds = array<i64: 8, 256>}]} {
    %c0 = arith.constant 0 : index
    %c0_0 = arith.constant 0 : index
    %0 = vector.load %arg1[%c0, %c0_0] : memref<8x32xf32, #tpu.memory_space<vmem>>, vector<8x32xf32>
    %c0_1 = arith.constant 0 : index
    %c0_2 = arith.constant 0 : index
    %1 = vector.load %arg2[%c0_1, %c0_2] : memref<32x256xf32, #tpu.memory_space<vmem>>, vector<32x256xf32>
    %cst = arith.constant dense<0.000000e+00> : vector<8x256xf32>
    %2 = tpu.matmul %0, %1, %cst {dimension_numbers = #tpu.dot_dimension_numbers<[1], [0], [0], [1], [0, 0, 1, 1], [], []>} : vector<8x32xf32>, vector<32x256xf32>, vector<8x256xf32> -> vector<8x256xf32>
    %c0_3 = arith.constant 0 : index
    %c0_4 = arith.constant 0 : index
    %3 = vector.load %arg3[%c0_3, %c0_4] : memref<1x256xf32, #tpu.memory_space<vmem>>, vector<1x256xf32>
    %4 = vector.broadcast %3 : vector<1x256xf32> to vector<8x256xf32>
    %5 = arith.addf %2, %4 : vector<8x256xf32>
    %cst_5 = arith.constant 0.000000e+00 : f32
    %6 = vector.broadcast %cst_5 : f32 to vector<8x256xf32>
    %7 = arith.maximumf %5, %6 : vector<8x256xf32>
    %c0_6 = arith.constant 0 : index
    %c0_7 = arith.constant 0 : index
    %8 = vector.load %arg4[%c0_6, %c0_7] : memref<8x256xf32, #tpu.memory_space<vmem>>, vector<8x256xf32>
    tpu.vector_store %arg4[%c0_6, %c0_7], %7 {strides = array<i32>} : memref<8x256xf32, #tpu.memory_space<vmem>>, vector<8x256xf32>,
    return
  }
  func.func @transform_0(%arg0: i32) -> (i32, i32) {
    %c0_i32 = arith.constant 0 : i32
    %c0_i32_0 = arith.constant 0 : i32
    return %arg0, %c0_i32 : i32, i32
  }
  func.func @transform_1(%arg0: i32) -> (i32, i32) {
    %c0_i32 = arith.constant 0 : i32
    %c0_i32_0 = arith.constant 0 : i32
    %c0_i32_1 = arith.constant 0 : i32
    return %c0_i32, %c0_i32_0 : i32, i32
  }
  func.func @transform_2(%arg0: i32) -> (i32, i32) {
    %c0_i32 = arith.constant 0 : i32
    %c0_i32_0 = arith.constant 0 : i32
    %c0_i32_1 = arith.constant 0 : i32
    return %c0_i32, %c0_i32_0 : i32, i32
  }
  func.func @transform_3(%arg0: i32) -> (i32, i32) {
    %c0_i32 = arith.constant 0 : i32
    %c0_i32_0 = arith.constant 0 : i32
    return %arg0, %c0_i32 : i32, i32
  }
}

</mosaic_0001>

<bundles_post_ra>
// kernel: nature_cnn_forward.1
= control target key start
LH: loop header
LB: loop body
LE: loop exit
PB: predicated region body
PF: predicated region fallthrough
CT: control target
= control target key end

     0   :  { %8 = vsyncpa [#allocation3], 0  ;;  %s316_s0 = inlined_call_operand.hbm [shape: f32[8,32], index: 0, kind: input, shape index: {}]   ;;  %s317_s1 = inlined_call_operand.hbm [shape: f32[32,256], index: 1, kind: input, shape index: {}]   ;;  %s318_s2 = inlined_call_operand.vmem [shape: f32[1,256], index: 2, kind: input, shape index: {}]   ;;  %s319_s3 = inlined_call_operand.hbm [shape: f32[8,256], index: 3, kind: output, shape index: {}]  }
   0x1   :  { %9 = vsyncpa [#allocation6], 0 }
   0x2   :  { %10 = vsyncpa [#allocation4], 0  ;;  %s244_s12 = smov [#allocation2]   ;;  %s245_s14 = smov [#allocation5]  }
   0x3   :  { %s17_s13 = sshll.u32 %s244_s12, 4  ;;  %s26_s15 = sshll.u32 %s245_s14, 4  ;;  %s18_s13 = int_to_ptr.vmem [resolvable:$true] %s17_s13  ;;  %s270_s15 = int_to_ptr.vmem [resolvable:$true] %s26_s15 }
   0x4   :  { %s172_s18 = scalar_lea.hbm %s316_s0, 128 }
   0x5   :  { %p173_p0 = scmp.ne.s32.totalorder %s316_s0, %s172_s18  ;;  %p176_p1 = scmp.lt.u32.totalorder %s172_s18, %s316_s0 }
   0x7   :  { %p178_p2 = pnand %p176_p1, %p173_p0 }
   0x9   :  { %181 = shalt.err (!%p178_p2)
}
   0xa   :  { %s182_s23 = scalar_lea.vmem %s18_s13, 128  ;;  %p187_p4 = scmp.lt.s32.totalorder %s18_s13, %s18_s13 }
   0xb   :  { %p183_p3 = scmp.ne.s32.totalorder %s18_s13, %s182_s23  ;;  %p188_p5 = scmp.lt.s32.totalorder %s182_s23, %s182_s23 }
   0xd   :  { %p189_p6 = por %p188_p5, %p187_p4 }
   0xf   :  { %p190_p7 = pnand %p189_p6, %p183_p3 }
  0x11   :  { %193 = shalt.err (!%p190_p7)
}
  0x12   :  { %20 = dma.hbm_to_vmem [thread:$0]  %s316_s0, 128, %s18_s13, [#allocation3]  }
  0x13   :  { %s194_s28 = scalar_lea.hbm %s317_s1, 1024 }
  0x14   :  { %p195_p8 = scmp.ne.s32.totalorder %s317_s1, %s194_s28  ;;  %p198_p9 = scmp.lt.u32.totalorder %s194_s28, %s317_s1 }
  0x16   :  { %p200_p10 = pnand %p198_p9, %p195_p8 }
  0x18   :  { %203 = shalt.err (!%p200_p10)
}
  0x19   :  { %s204_s6 = scalar_lea.vmem %s270_s15, 1024  ;;  %p209_p12 = scmp.lt.s32.totalorder %s270_s15, %s270_s15 }
  0x1a   :  { %p205_p11 = scmp.ne.s32.totalorder %s270_s15, %s204_s6  ;;  %p210_p13 = scmp.lt.s32.totalorder %s204_s6, %s204_s6 }
  0x1c   :  { %p211_p0 = por %p210_p13, %p209_p12 }
  0x1e   :  { %p212_p1 = pnand %p211_p0, %p205_p11 }
  0x20   :  { %215 = shalt.err (!%p212_p1)
}
  0x21   :  { %s246_s0 = smov 256   ;;  %s247_s7 = smov 16  }
  0x22   :  { %32 = dma.hbm_to_vmem [thread:$0]  %s317_s1, 1024, %s270_s15, [#allocation6], %s246_s0, %s246_s0, %s247_s7  }
  0x23   :  { %238 = dma.done.wait [#allocation3], 128  }
  0x24   :  { %239 = vsyncadd [#allocation3], 4294967168 }
  0x25   :  { %240 = dma.done.wait [#allocation6], 1024  }
  0x26   :  { %241 = vsyncadd [#allocation6], 4294966272  ;;  %v248_v0 = vmov 0.0   ;;  %v43_v1 = vld [vmem:[#allocation5 + $0x8] sm:$0xff]  ;;  %v45_v2 = vld [vmem:[#allocation5 + $0x18] sm:$0xff]  ;;  %vm62_vm0 = vcmask 261120   ;;  %v52_v14 = vlaneseq }
  0x27   :  { %130 = vmatprep.mubr.f32.mxu0 %v248_v0  ;;  %v42_v3 = vld [vmem:[#allocation5] sm:$0xff]  ;;  %v158_v4 = vpack.c.bf16 %v45_v2, %v43_v1  ;;  %v44_v5 = vld [vmem:[#allocation5 + $0x10] sm:$0xff]  ;;  %v47_v6 = vld [vmem:[#allocation5 + $0x28] sm:$0xff]  ;;  %s249_s11 = smov [#allocation7]  }
  0x28   :  { %v49_v7 = vld [vmem:[#allocation5 + $0x38] sm:$0xff]  ;;  %v160_v8 = vpack.c.bf16 %v44_v5, %v42_v3  ;;  %v46_v10 = vld [vmem:[#allocation5 + $0x20] sm:$0xff]  ;;  %v48_v11 = vld [vmem:[#allocation5 + $0x30] sm:$0xff]  ;;  %v53_v15 = vshrl.u32 %v52_v14, 7  ;;  %s147_s12 = sshll.u32 %s249_s11, 4  ;;  %s148_s12 = int_to_ptr.vmem [resolvable:$true] %s147_s12 }
  0x29   :  { %v162_v9 = vpack.c.bf16 %v49_v7, %v47_v6  ;;  %159 = vmatprep.subr.bf16.mxu0 %v158_v4  ;;  %v164_v12 = vpack.c.bf16 %v48_v11, %v46_v10  ;;  %v41_v13 = vld [vmem:[#allocation2] sm:$0xff]  ;;  %s216_s13 = scalar_lea.vmem %s148_s12, 256  ;;  %p221_p3 = scmp.lt.s32.totalorder %s148_s12, %s148_s12 }
  0x2a   :  { %161 = vmatpush1.bf16.msra.mxu0 %v160_v8  ;;  %v54_v16 = vsub.s32 0, %v53_v15  ;;  %v50_v17 = vld [vmem:[%s318_s2] sm:$0x3]  ;;  %v58_v18 = vsub.s32 1, %v53_v15  ;;  %p217_p2 = scmp.ne.s32.totalorder %s148_s12, %s216_s13  ;;  %p222_p4 = scmp.lt.s32.totalorder %s216_s13, %s216_s13 }
  0x2b   :  { %163 = vmatprep.subr.bf16.mxu0 %v162_v9 }
  0x2c   :  { %v55_v19 = vrot.slane %v50_v17, %v54_v16  ;;  %v59_v20 = vrot.slane %v50_v17, %v58_v18  ;;  %p223_p5 = por %p222_p4, %p221_p3 }
  0x2e   :  { %165 = vmatpush1.bf16.msra.mxu0 %v164_v12  ;;  %p224_p6 = pnand %p223_p5, %p217_p2 }
  0x31   :  { %157 = vmatmul.mubr.msk.f32.vlgmr.msra.gmra.mrb[0].mxu0 %vm62_vm0, %v41_v13 }
 0x104   :  { %v132_v21 = vpop.f32.mrb[0].mxu0 }
 0x105   :  { %v133_v22 = vadd.f32 %v132_v21, %v55_v19  ;;  %v134_v23 = vpop.f32.mrb[1].mxu0 }
 0x106   :  { %v135_v24 = vadd.f32 %v134_v23, %v59_v20 }
 0x107   :  { %v137_v25 = vmax.f32 %v133_v22, 0.0 }
 0x108   :  { %v138_v26 = vmax.f32 %v135_v24, 0.0 }
 0x109   :  { %139 = vst [vmem:[#allocation7] sm:$0xff] %v137_v25 }
 0x10a   :  { %140 = vst [vmem:[#allocation7 + $0x8] sm:$0xff] %v138_v26 }
 0x10b   :  { %227 = shalt.err (!%p224_p6)
}
 0x10c   :  { %s228_s15 = scalar_lea.hbm %s319_s3, 256 }
 0x10d   :  { %p229_p7 = scmp.ne.s32.totalorder %s319_s3, %s228_s15  ;;  %p232_p8 = scmp.lt.u32.totalorder %s228_s15, %s319_s3 }
 0x10f   :  { %p234_p9 = pnand %p232_p8, %p229_p7 }
 0x111   :  { %237 = shalt.err (!%p234_p9)
}
 0x112   :  { %150 = dma.vmem_to_hbm [thread:$0]  %s148_s12, 256, %s319_s3, [#allocation4]  }
 0x113   :  { %242 = dma.done.wait [#allocation4], 256  }
 0x114   :  { %243 = vsyncadd [#allocation4], 4294967040 }
 0x115   :  { %154 = vsyncpa [#allocation3], 1 }
 0x116   :  { %155 = vsyncpa [#allocation6], 1 }
 0x117   :  { %156 = vsyncpa [#allocation4], 1 }

</bundles_post_ra>
